<compile_context>
chip_gen: v7x
topology: tpu7x:2x2x1
jax: 0.10.0
libtpu: 0.0.40
codegen_flags: <defaults>
</compile_context>

<pallas_src>
import jax
import jax.numpy as jnp
from jax.experimental import pallas as pl
from jax.experimental.pallas import tpu as pltpu


def _res_gate_kernel(x_ref, y_ref, o_ref):
    # Elementwise residual add on the VPU over the current VMEM tile.
    o_ref[...] = x_ref[...] + y_ref[...]


# ~2 MiB per block: 3 arrays x 2 pipeline buffers ~= 12 MiB of VMEM.  Safe on
# v5e (16 MiB default scoped), v6e (32 MiB default) and v7x (32 MiB default,
# 64 MiB physical), while already in the 85%+ of-HBM-roofline regime.
_TARGET_BLOCK_BYTES = 2 * 1024 * 1024

# Preferred lane widths (all multiples of 128), largest first.
_LANE_CANDIDATES = (8192, 4096, 2048, 1024, 512, 256, 128)


def _sublane_align(itemsize: int) -> int:
    # Packed sublane alignment: f32 -> 8, bf16 -> 16, int8/fp8 -> 32.
    return max(8, 32 // max(1, itemsize))


def _lane_dense_layout(n_elems: int, itemsize: int):
    """Factor n_elems into (rows, cols) with cols a big multiple of 128, if possible."""
    for c in _LANE_CANDIDATES:
        if n_elems % c == 0 and c * itemsize <= _TARGET_BLOCK_BYTES:
            return n_elems // c, c
    return None


def _choose_row_tile(rows: int, cols: int, itemsize: int,
                     target_block_bytes: int) -> int:
    """Row-tile so the (tr, cols) block stays within the per-block byte budget."""
    row_bytes = max(1, cols * itemsize)
    tr = target_block_bytes // row_bytes
    align = _sublane_align(itemsize)
    tr = (tr // align) * align
    if tr <= 0:
        tr = align
    if tr >= rows:
        return rows  # full extent along rows is always a legal block dim
    return tr        # multiple of the sublane alignment, < rows -> legal


def res_gate(x, y, *, target_block_bytes: int = _TARGET_BLOCK_BYTES,
             donate_x: bool = False):
    """Residual skip connection: returns x + y, computed in a Pallas TPU kernel."""
    assert x.shape == y.shape, "ResGate requires matching shapes (x + y)"
    assert x.dtype == y.dtype
    orig_shape = x.shape
    itemsize = jnp.dtype(x.dtype).itemsize

    n_elems = 1
    for d in orig_shape:
        n_elems *= d

    if n_elems == 0:
        # Degenerate empty tensor: nothing to compute.
        return x

    # Prefer a lane-dense 2D view (cols a large multiple of 128); otherwise keep
    # the original last dim on the lane axis.
    layout = _lane_dense_layout(n_elems, itemsize)
    if layout is not None:
        rows, cols = layout
    else:
        cols = orig_shape[-1] if orig_shape else 1
        rows = n_elems // cols

    x2 = x.reshape(rows, cols)
    y2 = y.reshape(rows, cols)

    tr = _choose_row_tile(rows, cols, itemsize, target_block_bytes)
    grid = (pl.cdiv(rows, tr),)  # partial trailing block handled by Pallas

    extra_kwargs = {}
    if donate_x:
        # Optional: write the result in place over x when the caller can donate it.
        extra_kwargs["input_output_aliases"] = {0: 0}

    out2 = pl.pallas_call(
        _res_gate_kernel,
        out_shape=jax.ShapeDtypeStruct((rows, cols), x.dtype),
        grid_spec=pltpu.PrefetchScalarGridSpec(
            num_scalar_prefetch=0,
            grid=grid,
            in_specs=[
                pl.BlockSpec((tr, cols), lambda i: (i, 0)),
                pl.BlockSpec((tr, cols), lambda i: (i, 0)),
            ],
            out_specs=pl.BlockSpec((tr, cols), lambda i: (i, 0)),
        ),
        compiler_params=pltpu.CompilerParams(
            dimension_semantics=("parallel",),   # lets v7x shard steps across both TCs
            vmem_limit_bytes=32 * 1024 * 1024,   # >> 6x block bytes; safe on all gens
        ),
        cost_estimate=pl.CostEstimate(
            flops=n_elems,
            transcendentals=0,
            bytes_accessed=3 * n_elems * itemsize,
        ),
        **extra_kwargs,
    )(x2, y2)

    return out2.reshape(orig_shape)


if __name__ == "__main__":
    key = jax.random.PRNGKey(0)
    kx, ky = jax.random.split(key)

    # Small transformer-style residual shapes: batch=2, seq=8, hidden=32.
    x = jax.random.normal(kx, (2, 8, 32), dtype=jnp.float32)
    y = jax.random.normal(ky, (2, 8, 32), dtype=jnp.float32)

    out = res_gate(x, y)
    jax.block_until_ready(out)

    expected = x + y
    assert out.shape == expected.shape
    assert jnp.allclose(out, expected, atol=1e-6, rtol=1e-6)

    print("KERNEL_OK")
</pallas_src>

<mosaic_0001>
module attributes {stable_mosaic.version = 11 : i64} {
  func.func @_res_gate_kernel(%arg0: i32, %arg1: memref<1x512xf32, #tpu.memory_space<vmem>>, %arg2: memref<1x512xf32, #tpu.memory_space<vmem>>, %arg3: memref<1x512xf32, #tpu.memory_space<vmem>>) attributes {dimension_semantics = [#tpu.dimension_semantics<parallel>], iteration_bounds = array<i64: 1>, scalar_prefetch = 0 : i64, scratch_operands = 0 : i64, tpu.core_type = #tpu.core_type<tc>, window_params = [{transform_indices = @transform_0, window_bounds = array<i64: 1, 512>}, {transform_indices = @transform_1, window_bounds = array<i64: 1, 512>}, {transform_indices = @transform_2, window_bounds = array<i64: 1, 512>}]} {
    %c0 = arith.constant 0 : index
    %c0_0 = arith.constant 0 : index
    %0 = vector.load %arg1[%c0, %c0_0] : memref<1x512xf32, #tpu.memory_space<vmem>>, vector<1x512xf32>
    %c0_1 = arith.constant 0 : index
    %c0_2 = arith.constant 0 : index
    %1 = vector.load %arg2[%c0_1, %c0_2] : memref<1x512xf32, #tpu.memory_space<vmem>>, vector<1x512xf32>
    %2 = arith.addf %0, %1 : vector<1x512xf32>
    %c0_3 = arith.constant 0 : index
    %c0_4 = arith.constant 0 : index
    %3 = vector.load %arg3[%c0_3, %c0_4] : memref<1x512xf32, #tpu.memory_space<vmem>>, vector<1x512xf32>
    tpu.vector_store %arg3[%c0_3, %c0_4], %2 {strides = array<i32>} : memref<1x512xf32, #tpu.memory_space<vmem>>, vector<1x512xf32>,
    return
  }
  func.func @transform_0(%arg0: i32) -> (i32, i32) {
    %c0_i32 = arith.constant 0 : i32
    %c0_i32_0 = arith.constant 0 : i32
    return %arg0, %c0_i32 : i32, i32
  }
  func.func @transform_1(%arg0: i32) -> (i32, i32) {
    %c0_i32 = arith.constant 0 : i32
    %c0_i32_0 = arith.constant 0 : i32
    return %arg0, %c0_i32 : i32, i32
  }
  func.func @transform_2(%arg0: i32) -> (i32, i32) {
    %c0_i32 = arith.constant 0 : i32
    %c0_i32_0 = arith.constant 0 : i32
    return %arg0, %c0_i32 : i32, i32
  }
}

</mosaic_0001>

<bundles_post_ra>
// kernel: tpu_custom_call.1
= control target key start
LH: loop header
LB: loop body
LE: loop exit
PB: predicated region body
PF: predicated region fallthrough
CT: control target
= control target key end

     0   :  { %7 = vsyncpa [#allocation3], 0  ;;  %s189_s0 = inlined_call_operand.hbm [shape: f32[1,512], index: 0, kind: input, shape index: {}]   ;;  %s190_s1 = inlined_call_operand.hbm [shape: f32[1,512], index: 1, kind: input, shape index: {}]   ;;  %s191_s2 = inlined_call_operand.hbm [shape: f32[1,512], index: 2, kind: output, shape index: {}]  }
   0x1   :  { %8 = vsyncpa [#allocation6], 0 }
   0x2   :  { %9 = vsyncpa [#allocation4], 0  ;;  %s135_s9 = smov [#allocation2]   ;;  %s136_s11 = smov [#allocation5]  }
   0x3   :  { %s16_s10 = sshll.u32 %s135_s9, 4  ;;  %s26_s12 = sshll.u32 %s136_s11, 4  ;;  %s17_s10 = int_to_ptr.vmem [resolvable:$true] %s16_s10  ;;  %s27_s12 = int_to_ptr.vmem [resolvable:$true] %s26_s12 }
   0x4   :  { %s63_s15 = scalar_lea.hbm %s189_s0, 64 }
   0x5   :  { %p64_p0 = scmp.ne.s32.totalorder %s189_s0, %s63_s15  ;;  %p67_p1 = scmp.lt.u32.totalorder %s63_s15, %s189_s0 }
   0x7   :  { %p69_p2 = pnand %p67_p1, %p64_p0 }
   0x9   :  { %72 = shalt.err (!%p69_p2)
}
   0xa   :  { %s73_s20 = scalar_lea.vmem %s17_s10, 64  ;;  %p78_p4 = scmp.lt.s32.totalorder %s17_s10, %s17_s10 }
   0xb   :  { %p74_p3 = scmp.ne.s32.totalorder %s17_s10, %s73_s20  ;;  %p79_p5 = scmp.lt.s32.totalorder %s73_s20, %s73_s20 }
   0xd   :  { %p80_p6 = por %p79_p5, %p78_p4 }
   0xf   :  { %p81_p7 = pnand %p80_p6, %p74_p3 }
  0x11   :  { %84 = shalt.err (!%p81_p7)
}
  0x12   :  { %19 = dma.hbm_to_vmem [thread:$0]  %s189_s0, 64, %s17_s10, [#allocation3]  }
  0x13   :  { %s85_s25 = scalar_lea.hbm %s190_s1, 64 }
  0x14   :  { %p86_p8 = scmp.ne.s32.totalorder %s190_s1, %s85_s25  ;;  %p89_p9 = scmp.lt.u32.totalorder %s85_s25, %s190_s1 }
  0x16   :  { %p91_p10 = pnand %p89_p9, %p86_p8 }
  0x18   :  { %94 = shalt.err (!%p91_p10)
}
  0x19   :  { %s95_s30 = scalar_lea.vmem %s27_s12, 64  ;;  %p100_p12 = scmp.lt.s32.totalorder %s27_s12, %s27_s12 }
  0x1a   :  { %p96_p11 = scmp.ne.s32.totalorder %s27_s12, %s95_s30  ;;  %p101_p13 = scmp.lt.s32.totalorder %s95_s30, %s95_s30 }
  0x1c   :  { %p102_p0 = por %p101_p13, %p100_p12 }
  0x1e   :  { %p103_p1 = pnand %p102_p0, %p96_p11 }
  0x20   :  { %106 = shalt.err (!%p103_p1)
}
  0x21   :  { %29 = dma.hbm_to_vmem [thread:$0]  %s190_s1, 64, %s27_s12, [#allocation6]  }
  0x22   :  { %129 = dma.done.wait [#allocation3], 64  }
  0x23   :  { %130 = vsyncadd [#allocation3], 4294967232 }
  0x24   :  { %131 = dma.done.wait [#allocation6], 64  }
  0x25   :  { %132 = vsyncadd [#allocation6], 4294967232  ;;  %v39_v0 = vlaneseq  ;;  %s137_s4 = smov [#allocation7]   ;;  %v36_v1 = vld [vmem:[#allocation2] sm:$0xf] }
  0x26   :  { %s50_s5 = sshll.u32 %s137_s4, 4  ;;  %v37_v2 = vld [vmem:[#allocation5] sm:$0xf]  ;;  %s51_s5 = int_to_ptr.vmem [resolvable:$true] %s50_s5 }
  0x27   :  { %vm41_vm0 = vcmp.lt.s32.totalorder %v39_v0, 512  ;;  %v38_v3 = vadd.f32 %v37_v2, %v36_v1  ;;  %s107_s6 = scalar_lea.vmem %s51_s5, 64  ;;  %p112_p3 = scmp.lt.s32.totalorder %s51_s5, %s51_s5 }
  0x28   :  { %p108_p2 = scmp.ne.s32.totalorder %s51_s5, %s107_s6  ;;  %p113_p4 = scmp.lt.s32.totalorder %s107_s6, %s107_s6 }
  0x29   :  { %43 = vst.msk [vmem:[#allocation7] sm:$0xf] %vm41_vm0, %v38_v3 }
  0x2a   :  { %p114_p5 = por %p113_p4, %p112_p3 }
  0x2c   :  { %p115_p6 = pnand %p114_p5, %p108_p2 }
  0x2e   :  { %118 = shalt.err (!%p115_p6)
}
  0x2f   :  { %s119_s8 = scalar_lea.hbm %s191_s2, 64 }
  0x30   :  { %p120_p7 = scmp.ne.s32.totalorder %s191_s2, %s119_s8  ;;  %p123_p8 = scmp.lt.u32.totalorder %s119_s8, %s191_s2 }
  0x32   :  { %p125_p9 = pnand %p123_p8, %p120_p7 }
  0x34   :  { %128 = shalt.err (!%p125_p9)
}
  0x35   :  { %53 = dma.vmem_to_hbm [thread:$0]  %s51_s5, 64, %s191_s2, [#allocation4]  }
  0x36   :  { %133 = dma.done.wait [#allocation4], 64  }
  0x37   :  { %134 = vsyncadd [#allocation4], 4294967232 }
  0x38   :  { %57 = vsyncpa [#allocation3], 1 }
  0x39   :  { %58 = vsyncpa [#allocation6], 1 }
  0x3a   :  { %59 = vsyncpa [#allocation4], 1 }

</bundles_post_ra>
